<compile_context>
chip_gen: v7x
topology: tpu7x:2x2x1
jax: 0.10.0
libtpu: 0.0.40
codegen_flags: <defaults>
</compile_context>

<pallas_src>
import jax
import jax.numpy as jnp
from jax import lax
from jax.experimental import pallas as pl
from jax.experimental.pallas import tpu as pltpu  # noqa: F401  (kept for scaling variants)


def _cnn_embded_kernel(tgt_ref, params_ref, out_ref):
    # tgt_ref:    (3, R)      int32  per-tap one-hot target rows: k*V + id[l+k-1],
    #                                 or -1 where tap k falls on the zero padding
    #                                 (also exactly the batch boundaries).
    # params_ref: (O, 3V + 1) f32    folded (Conv1d ∘ Embedding) weight, last
    #                                 column is the conv bias.
    # out_ref:    (O, R)      f32    ReLU(conv) with positions (b*L + l) on lanes.
    K = params_ref.shape[1]                       # 3V + 1
    R = tgt_ref.shape[1]                          # B * L

    tgt = tgt_ref[...]                            # (3, R) i32
    row = lax.broadcasted_iota(jnp.int32, (K, R), 0)

    # Exact one-hot of the three shifted token ids plus a constant ones row
    # (row == K-1) that picks up the bias column.  The -1 sentinels never
    # match, realizing Conv1d zero padding and batch boundaries for free.
    x = ((row == tgt[0:1, :]) | (row == tgt[1:2, :]) | (row == tgt[2:3, :])
         | (row == K - 1)).astype(jnp.float32)    # (3V+1, R)

    # Single MXU pass: fused embedding-gather + 3-tap conv + bias.
    acc = jnp.dot(params_ref[...], x, preferred_element_type=jnp.float32)  # (O, R)
    out_ref[...] = jnp.maximum(acc, 0.0)          # one full-block store


def pack_cnn_embded_params(emb_table, conv_w, conv_b):
    """One-time (static) fold of the embedding table into the Conv1d weights.

    emb_table: (V, H) f32, conv_w: (O, H, 3) f32 (PyTorch layout), conv_b: (O,)
    returns:   (O, 3V + 1) f32 — columns k*V + v hold sum_h w[o,h,k]*emb[v,h];
               the last column is the bias.
    """
    V, _ = emb_table.shape
    O = conv_w.shape[0]
    m = jnp.einsum('ohk,vh->okv',
                   conv_w.astype(jnp.float32),
                   emb_table.astype(jnp.float32),
                   precision=lax.Precision.HIGHEST).reshape(O, 3 * V)
    return jnp.concatenate([m, conv_b.reshape(O, 1).astype(jnp.float32)], axis=1)


@jax.jit
def cnn_embded_forward(x_ids, params):
    """CNN_embded.forward: Embedding -> Conv1d(k=3, pad=1) -> ReLU -> Flatten.

    x_ids:  (B, L) int token ids in [0, V)
    params: (O, 3V+1) f32 from pack_cnn_embded_params (static, precomputed once)
    returns (B, O*L) f32
    """
    B, L = x_ids.shape
    O, K = params.shape
    V = (K - 1) // 3
    R = B * L

    # Data-dependent prep (fuses into one tiny XLA int fusion): tap k of
    # position l reads the id at l+k-1; pad with -1 so edge taps (which are
    # also the batch boundaries in the flattened b*L+l ordering) never match.
    ids = x_ids.astype(jnp.int32)
    padded = jnp.pad(ids, ((0, 0), (1, 1)), constant_values=-1)        # (B, L+2)
    taps = jnp.stack([padded[:, k:k + L] for k in range(3)], axis=0)   # (3, B, L)
    offs = (jnp.arange(3, dtype=jnp.int32) * V).reshape(3, 1, 1)
    targets = jnp.where(taps >= 0, taps + offs, -1).reshape(3, R)      # (3, R)

    # Single invocation, whole-array VMEM blocks (everything is a few KiB).
    # Scaling note (v7x: 64 MiB VMEM, 2 TCs): if B*L grows, add a leading
    # "parallel" grid axis over position tiles with a lane dim that is a
    # multiple of 128 and re-derive the VMEM budget; if V grows beyond toy
    # size, replace the one-hot matmul with a DMA row-gather of the embedding
    # table from HBM (memory_space=pl.ANY / scalar-prefetch-driven index_map).
    out_obl = pl.pallas_call(
        _cnn_embded_kernel,
        out_shape=jax.ShapeDtypeStruct((O, R), jnp.float32),
    )(targets, params)

    # (O, B*L) -> (B, O, L) -> (B, O*L): matches swapaxes + nn.Flatten.
    return out_obl.reshape(O, B, L).transpose(1, 0, 2).reshape(B, O * L)


if __name__ == "__main__":
    hidden_dim = 32     # H
    out_channels = 16   # O
    vocab_size = 20     # V
    B, L = 2, 8         # batch, sequence length

    key = jax.random.PRNGKey(0)
    k1, k2, k3, k4 = jax.random.split(key, 4)

    emb_table = jax.random.normal(k1, (vocab_size, hidden_dim), jnp.float32)
    fan_in = hidden_dim * 3
    bound = 1.0 / (fan_in ** 0.5)
    conv_w = jax.random.uniform(k2, (out_channels, hidden_dim, 3),
                                jnp.float32, -bound, bound)
    conv_b = jax.random.uniform(k3, (out_channels,), jnp.float32, -bound, bound)
    x_ids = jax.random.randint(k4, (B, L), 0, vocab_size, dtype=jnp.int32)

    # Static weight fold done ONCE (outside the per-call path).
    params = jax.block_until_ready(pack_cnn_embded_params(emb_table, conv_w, conv_b))

    out = cnn_embded_forward(x_ids, params)
    jax.block_until_ready(out)
    assert out.shape == (B, out_channels * L), out.shape

    # Pure-JAX reference (same semantics as the PyTorch module) for validation.
    emb = jnp.take(emb_table, x_ids, axis=0)                               # (B, L, H)
    emb_pad = jnp.pad(emb, ((0, 0), (1, 1), (0, 0)))                       # (B, L+2, H)
    taps = jnp.stack([emb_pad[:, k:k + L, :] for k in range(3)], axis=2)   # (B, L, 3, H)
    ref = jnp.einsum('blkh,ohk->bol', taps, conv_w) + conv_b[None, :, None]
    ref = jnp.maximum(ref, 0.0).reshape(B, out_channels * L)
    err = float(jnp.max(jnp.abs(out - ref)))
    assert err < 1e-4, f"max abs err {err}"

    print("KERNEL_OK")
</pallas_src>

<mosaic_0001>
module attributes {stable_mosaic.version = 11 : i64} {
  func.func @_cnn_embded_kernel(%arg0: memref<3x16xi32, #tpu.memory_space<vmem>>, %arg1: memref<16x61xf32, #tpu.memory_space<vmem>>, %arg2: memref<16x16xf32, #tpu.memory_space<vmem>>) attributes {dimension_semantics = [], scalar_prefetch = 0 : i64, scratch_operands = 0 : i64, tpu.core_type = #tpu.core_type<tc>} {
    %c0 = arith.constant 0 : index
    %c0_0 = arith.constant 0 : index
    %0 = vector.load %arg0[%c0, %c0_0] : memref<3x16xi32, #tpu.memory_space<vmem>>, vector<3x16xi32>
    %1 = tpu.iota {dimensions = array<i32: 0>} : vector<61x16xi32>
    %2 = vector.extract_strided_slice %0 {offsets = [0, 0], sizes = [1, 16], strides = [1, 1]} : vector<3x16xi32> to vector<1x16xi32>
    %3 = vector.broadcast %2 : vector<1x16xi32> to vector<61x16xi32>
    %4 = arith.cmpi eq, %1, %3 : vector<61x16xi32>
    %5 = vector.extract_strided_slice %0 {offsets = [1, 0], sizes = [1, 16], strides = [1, 1]} : vector<3x16xi32> to vector<1x16xi32>
    %6 = vector.broadcast %5 : vector<1x16xi32> to vector<61x16xi32>
    %7 = arith.cmpi eq, %1, %6 : vector<61x16xi32>
    %8 = arith.ori %4, %7 : vector<61x16xi1>
    %9 = vector.extract_strided_slice %0 {offsets = [2, 0], sizes = [1, 16], strides = [1, 1]} : vector<3x16xi32> to vector<1x16xi32>
    %10 = vector.broadcast %9 : vector<1x16xi32> to vector<61x16xi32>
    %11 = arith.cmpi eq, %1, %10 : vector<61x16xi32>
    %12 = arith.ori %8, %11 : vector<61x16xi1>
    %c60_i32 = arith.constant 60 : i32
    %13 = vector.broadcast %c60_i32 : i32 to vector<61x16xi32>
    %14 = arith.cmpi eq, %1, %13 : vector<61x16xi32>
    %15 = arith.ori %12, %14 : vector<61x16xi1>
    %16 = arith.extui %15 : vector<61x16xi1> to vector<61x16xi32>
    %17 = arith.sitofp %16 : vector<61x16xi32> to vector<61x16xf32>
    %c0_1 = arith.constant 0 : index
    %c0_2 = arith.constant 0 : index
    %18 = vector.load %arg1[%c0_1, %c0_2] : memref<16x61xf32, #tpu.memory_space<vmem>>, vector<16x61xf32>
    %cst = arith.constant dense<0.000000e+00> : vector<16x16xf32>
    %19 = tpu.matmul %18, %17, %cst {dimension_numbers = #tpu.dot_dimension_numbers<[1], [0], [0], [1], [0, 0, 1, 1], [], []>} : vector<16x61xf32>, vector<61x16xf32>, vector<16x16xf32> -> vector<16x16xf32>
    %cst_3 = arith.constant 0.000000e+00 : f32
    %20 = vector.broadcast %cst_3 : f32 to vector<16x16xf32>
    %21 = arith.maximumf %19, %20 : vector<16x16xf32>
    %c0_4 = arith.constant 0 : index
    %c0_5 = arith.constant 0 : index
    %22 = vector.load %arg2[%c0_4, %c0_5] : memref<16x16xf32, #tpu.memory_space<vmem>>, vector<16x16xf32>
    tpu.vector_store %arg2[%c0_4, %c0_5], %21 {strides = array<i32>} : memref<16x16xf32, #tpu.memory_space<vmem>>, vector<16x16xf32>,
    return
  }
}

</mosaic_0001>

<bundles_post_ra>
// kernel: cnn_embded_forward.1
= control target key start
LH: loop header
LB: loop body
LE: loop exit
PB: predicated region body
PF: predicated region fallthrough
CT: control target
= control target key end

     0   :  { %v12_v0 = vlaneseq  ;;  %vm308_vm0 = vcmask 498688   ;;  %v270_v15 = vmov 1.0|1.0   ;;  %v271_v18 = vmov 0.0   ;;  %s305_s0 = inlined_call_operand.vmem [shape: s32[3,16], index: 0, kind: input, shape index: {}]   ;;  %s306_s1 = inlined_call_operand.vmem [shape: f32[16,61], index: 1, kind: input, shape index: {}]   ;;  %s307_s2 = inlined_call_operand.vmem [shape: f32[16,16], index: 2, kind: output, shape index: {}]  }
   0x1   :  { %v105_v1 = vld [vmem:[%s306_s1] sm:$0xff]  ;;  %v272_v20 = vmov 1.0   ;;  %v106_v22 = vld [vmem:[%s306_s1 + $0x8] sm:$0xff] }
   0x2   :  { %v13_v2 = vshrl.u32 %v12_v0, 7  ;;  %246 = vmatprep.mubr.msk.f32.mxu0 %vm308_vm0, %v105_v1  ;;  %v11_v3 = vld [vmem:[%s305_s0] sm:$0x7] }
   0x4   :  { %v14_v4 = vadd.s32 8, %v13_v2  ;;  %v23_v5 = vsub.s32 0, %v13_v2  ;;  %v35_v6 = vsub.s32 1, %v13_v2  ;;  %v55_v7 = vsub.s32 2, %v13_v2 }
   0x5   :  { %v15_v11 = vadd.s32 16, %v13_v2  ;;  %v16_v12 = vadd.s32 24, %v13_v2  ;;  %v17_v13 = vadd.s32 32, %v13_v2  ;;  %v18_v14 = vadd.s32 40, %v13_v2 }
   0x6   :  { %v24_v8 = vrot.slane %v11_v3, %v23_v5  ;;  %v36_v9 = vrot.slane %v11_v3, %v35_v6  ;;  %v56_v10 = vrot.slane %v11_v3, %v55_v7  ;;  %v19_v16 = vadd.s32 48, %v13_v2 }
   0x7   :  { %v20_v17 = vadd.s32 56, %v13_v2 }
   0x8   :  { %vm25_vm1 = vcmp.eq.s32.totalorder %v13_v2, %v24_v8  ;;  %vm26_vm2 = vcmp.eq.s32.totalorder %v14_v4, %v24_v8  ;;  %vm37_vm3 = vcmp.eq.s32.totalorder %v13_v2, %v36_v9  ;;  %vm38_vm4 = vcmp.eq.s32.totalorder %v14_v4, %v36_v9 }
   0x9   :  { %vm45_vm5 = vmor %vm25_vm1, %vm37_vm3  ;;  %vm57_vm6 = vcmp.eq.s32.totalorder %v13_v2, %v56_v10  ;;  %vm58_vm7 = vcmp.eq.s32.totalorder %v14_v4, %v56_v10  ;;  %vm27_vm10 = vcmp.eq.s32.totalorder %v15_v11, %v24_v8  ;;  %vm39_vm11 = vcmp.eq.s32.totalorder %v15_v11, %v36_v9 }
   0xa   :  { %vm46_vm8 = vmor %vm26_vm2, %vm38_vm4  ;;  %vm28_vm13 = vcmp.eq.s32.totalorder %v16_v12, %v24_v8  ;;  %vm40_vm14 = vcmp.eq.s32.totalorder %v16_v12, %v36_v9  ;;  %vm59_vm0 = vcmp.eq.s32.totalorder %v15_v11, %v56_v10  ;;  %vm60_vm3 = vcmp.eq.s32.totalorder %v16_v12, %v56_v10 }
   0xb   :  { %vm65_vm9 = vmor %vm45_vm5, %vm57_vm6  ;;  %vm29_vm5 = vcmp.eq.s32.totalorder %v17_v13, %v24_v8  ;;  %vm41_vm6 = vcmp.eq.s32.totalorder %v17_v13, %v36_v9 }
   0xc   :  { %vm66_vm12 = vmor %vm46_vm8, %vm58_vm7  ;;  %vm30_vm8 = vcmp.eq.s32.totalorder %v18_v14, %v24_v8 }
   0xd   :  { %vm249_vm15 = vmpackc.low %vm66_vm12, %vm65_vm9  ;;  %vm42_vm9 = vcmp.eq.s32.totalorder %v18_v14, %v36_v9 }
   0xe   :  { %250 = vmatprep.subr.msk.bf16.mxu0 %vm249_vm15, %v270_v15  ;;  %vm47_vm1 = vmor %vm27_vm10, %vm39_vm11  ;;  %vm61_vm10 = vcmp.eq.s32.totalorder %v17_v13, %v56_v10 }
   0xf   :  { %252 = vmatpush3.bf16.msk.msra.mxu0 %vm249_vm15, %v270_v15  ;;  %vm48_vm2 = vmor %vm28_vm13, %vm40_vm14  ;;  %vm62_vm15 = vcmp.eq.s32.totalorder %v18_v14, %v56_v10 }
  0x10   :  { %vm67_vm4 = vmor %vm47_vm1, %vm59_vm0  ;;  %vm31_vm0 = vcmp.eq.s32.totalorder %v19_v16, %v24_v8  ;;  %vm43_vm1 = vcmp.eq.s32.totalorder %v19_v16, %v36_v9 }
  0x11   :  { %vm68_vm7 = vmor %vm48_vm2, %vm60_vm3  ;;  %vm32_vm3 = vcmp.eq.s32.totalorder %v20_v17, %v24_v8 }
  0x12   :  { %vm253_vm12 = vmpackc.low %vm68_vm7, %vm67_vm4  ;;  %vm44_vm4 = vcmp.eq.s32.totalorder %v20_v17, %v36_v9 }
  0x13   :  { %254 = vmatprep.subr.msk.bf16.mxu0 %vm253_vm12, %v270_v15  ;;  %vm49_vm11 = vmor %vm29_vm5, %vm41_vm6  ;;  %vm63_vm5 = vcmp.eq.s32.totalorder %v19_v16, %v56_v10 }
  0x14   :  { %256 = vmatpush3.bf16.msk.msra.mxu0 %vm253_vm12, %v270_v15  ;;  %vm50_vm13 = vmor %vm30_vm8, %vm42_vm9  ;;  %vm64_vm12 = vcmp.eq.s32.totalorder %v20_v17, %v56_v10  ;;  %vm80_vm9 = vcmp.eq.s32.totalorder %v20_v17, 60 }
  0x15   :  { %vm69_vm14 = vmor %vm49_vm11, %vm61_vm10  ;;  %vm114_vm11 = vcmask 1044480  }
  0x16   :  { %vm70_vm2 = vmor %vm50_vm13, %vm62_vm15 }
  0x17   :  { %vm257_vm7 = vmpackc.low %vm70_vm2, %vm69_vm14  ;;  %vm309_vm14 = vcmask 498688  }
  0x18   :  { %258 = vmatprep.subr.msk.bf16.mxu0 %vm257_vm7, %v270_v15  ;;  %vm51_vm6 = vmor %vm31_vm0, %vm43_vm1  ;;  %vm195_vm0 = vcmask 130048  }
  0x19   :  { %260 = vmatpush3.bf16.msk.msra.mxu0 %vm257_vm7, %v270_v15  ;;  %vm52_vm8 = vmor %vm32_vm3, %vm44_vm4 }
  0x1a   :  { %vm71_vm10 = vmor %vm51_vm6, %vm63_vm5 }
  0x1b   :  { %vm72_vm13 = vmor %vm52_vm8, %vm64_vm12 }
  0x1c   :  { %vm88_vm15 = vmor %vm72_vm13, %vm80_vm9 }
  0x1d   :  { %v209_v19 = vsel %vm88_vm15, 1.0, %v271_v18  ;;  %vm262_vm2 = vmpackc.low %vm114_vm11, %vm71_vm10 }
  0x1e   :  { %v261_v21 = vpack.c.bf16 %v209_v19, %v272_v20 }
  0x20   :  { %263 = vmatprep.subr.msk.bf16.mxu0 %vm262_vm2, %v261_v21 }
  0x21   :  { %266 = vmatpush3.bf16.msk.msra.mxu0 %vm262_vm2, %v261_v21 }
  0x24   :  { %247 = vmatmul.mubr.msk.f32.vlgmr.msra.gmra.mrb[0].mxu0 %vm309_vm14, %v106_v22 }
  0xf7   :  { %v248_v23 = vpop.f32.mrb[0].mxu0 }
  0xf8   :  { %v194_v24 = vmax.f32 %v248_v23, 0.0  ;;  %v184_v25 = vpop.f32.mrb[1].mxu0 }
  0xf9   :  { %v193_v26 = vmax.f32 %v184_v25, 0.0 }
  0xfa   :  { %197 = vst.msk [vmem:[%s307_s2 + $0x8] sm:$0xff] %vm195_vm0, %v194_v24 }
  0xfb   :  { %196 = vst.msk [vmem:[%s307_s2] sm:$0xff] %vm195_vm0, %v193_v26 }

</bundles_post_ra>
